<compile_context>
chip_gen: v7x
topology: tpu7x:2x2x1
jax: 0.10.0
libtpu: 0.0.40
codegen_flags: <defaults>
</compile_context>

<pallas_src>
import functools

import jax
import jax.numpy as jnp
from jax.experimental import pallas as pl
from jax.experimental.pallas import tpu as pltpu

# ---------------- model / input sizes (small, synthetic demo) ----------------
B = 8        # number of optimized input vectors (batch)
D_IN = 32    # input feature dim
HID = 64     # hidden dim of the frozen MLP
D_OUT = 16   # output dim of the frozen MLP

LANE = 128   # TPU lane width


def _round_up(n, m):
    return ((n + m - 1) // m) * m


def _cdiv(a, b):
    return -(-a // b)


# ---------------- Pallas kernel: frozen-MLP forward ----------------
def _mlp_forward_kernel(x_ref, w1_ref, b1_ref, w2_ref, b2_ref, o_ref):
    # x_ref : (tb, d_in_p)       lane-padded input tile
    # w1_ref: (d_in_p, hid_p)    resident padded W1
    # b1_ref: (1, hid_p)         resident padded b1 (broadcast add on VPU)
    # w2_ref: (hid_p, d_out_p)   resident padded W2
    # b2_ref: (1, d_out_p)       resident padded b2
    # o_ref : (tb, d_out_p)      lane-dense output tile
    h = jnp.dot(x_ref[...], w1_ref[...], preferred_element_type=jnp.float32)
    h = jnp.maximum(h + b1_ref[...], 0.0)
    out = jnp.dot(h, w2_ref[...], preferred_element_type=jnp.float32) + b2_ref[...]
    o_ref[...] = out.astype(o_ref.dtype)
    # TODO(synk): if this ever becomes compute-bound (bf16 I/O on v7x), split
    # the second dot into ~256-row sub-tiles so `h` stays closer to vregs.


# ---------------- one-time frozen-model preparation (outside the jit) --------
def prepare_frozen_model(w1, b1, w2, b2, *, weight_dtype=jnp.float32):
    """Pad the frozen model parameters to 128-lane multiples ONCE.

    The returned dict is meant to be closed over by (or donated to) the jitted
    forward so the padding never re-runs inside the optimization loop.
    """
    d_in, hid = w1.shape
    d_out = w2.shape[1]
    d_in_p = _round_up(d_in, LANE)
    hid_p = _round_up(hid, LANE)
    d_out_p = _round_up(d_out, LANE)

    w1_pad = (jnp.zeros((d_in_p, hid_p), weight_dtype)
              .at[:d_in, :hid].set(w1.astype(weight_dtype)))
    b1_pad = (jnp.zeros((1, hid_p), jnp.float32)
              .at[0, :hid].set(b1.astype(jnp.float32)))
    w2_pad = (jnp.zeros((hid_p, d_out_p), weight_dtype)
              .at[:hid, :d_out].set(w2.astype(weight_dtype)))
    b2_pad = (jnp.zeros((1, d_out_p), jnp.float32)
              .at[0, :d_out].set(b2.astype(jnp.float32)))

    return dict(
        w1_pad=w1_pad, b1_pad=b1_pad, w2_pad=w2_pad, b2_pad=b2_pad,
        d_in=d_in, hid=hid, d_out=d_out,            # logical dims (static)
    )


# ---------------- batch-tile selection ----------------
def _choose_batch_tile(b, block_b, sublane):
    """Pick a batch tile: big enough to amortize the ~0.35us per-step overhead,
    and (for batches > 512) an even number of >=2 grid steps so v7x megacore
    actually gets work on both TensorCores."""
    b0 = _round_up(max(b, sublane), sublane)
    if b0 <= 512:
        return b0                       # single step: launch-overhead bound anyway
    n_steps = max(2, _cdiv(b0, block_b))
    if n_steps % 2:
        n_steps += 1                    # even step count -> both TCs engage
    return _round_up(_cdiv(b0, n_steps), sublane)


# ---------------- core forward on lane-padded operands ----------------
def mlp_forward_padded(x_pad, w1_pad, b1_pad, w2_pad, b2_pad, *,
                       block_b=4096, out_dtype=None):
    """Frozen-MLP forward on lane-padded operands; returns lane-padded output.

    An optimizer loop should keep `input_vectors` permanently in this padded
    layout (and consume the padded output) to avoid per-step pad/slice passes.
    """
    b, d_in_p = x_pad.shape
    hid_p = w1_pad.shape[1]
    d_out_p = w2_pad.shape[1]
    out_dtype = out_dtype if out_dtype is not None else x_pad.dtype

    x_itemsize = jnp.dtype(x_pad.dtype).itemsize
    o_itemsize = jnp.dtype(out_dtype).itemsize
    w_itemsize = jnp.dtype(w1_pad.dtype).itemsize
    sublane = 16 if x_itemsize == 2 else 8          # bf16 packs 2 rows/sublane

    tb = _choose_batch_tile(b, block_b, sublane)
    b_pad = _round_up(b, tb)
    if b_pad != b:
        x_pad = jnp.zeros((b_pad, d_in_p), x_pad.dtype).at[:b].set(x_pad)
    grid = (b_pad // tb,)

    # Advisory cost estimate for the XLA scheduler.
    flops = 2 * b_pad * (d_in_p * hid_p + hid_p * d_out_p)
    bytes_accessed = (
        b_pad * d_in_p * x_itemsize
        + b_pad * d_out_p * o_itemsize
        + (d_in_p * hid_p + hid_p * d_out_p) * w_itemsize
        + (hid_p + d_out_p) * 4
    )

    # Scoped-VMEM budget: double-buffered x/out tiles + resident weights +
    # f32 hidden activation + margin.  Clamped to [32, 48] MiB so big tiles
    # don't trip v5e's 16 MiB default and we stay under v7x's 64 MiB physical.
    vmem_bytes = int(
        2 * (tb * d_in_p * x_itemsize + tb * d_out_p * o_itemsize)
        + 2 * (d_in_p * hid_p + hid_p * d_out_p) * w_itemsize
        + tb * hid_p * 4
        + (4 << 20)
    )
    vmem_bytes = min(max(vmem_bytes, 32 << 20), 48 << 20)

    out_pad = pl.pallas_call(
        _mlp_forward_kernel,
        out_shape=jax.ShapeDtypeStruct((b_pad, d_out_p), out_dtype),
        grid=grid,
        in_specs=[
            pl.BlockSpec((tb, d_in_p), lambda i: (i, 0)),       # x: tiled over batch
            pl.BlockSpec((d_in_p, hid_p), lambda i: (0, 0)),    # W1: resident
            pl.BlockSpec((1, hid_p), lambda i: (0, 0)),         # b1: resident
            pl.BlockSpec((hid_p, d_out_p), lambda i: (0, 0)),   # W2: resident
            pl.BlockSpec((1, d_out_p), lambda i: (0, 0)),       # b2: resident
        ],
        out_specs=pl.BlockSpec((tb, d_out_p), lambda i: (i, 0)),
        compiler_params=pltpu.CompilerParams(
            dimension_semantics=("parallel",),
            vmem_limit_bytes=vmem_bytes,
        ),
        cost_estimate=pl.CostEstimate(
            flops=flops, transcendentals=0, bytes_accessed=bytes_accessed),
    )(x_pad, w1_pad, b1_pad, w2_pad, b2_pad)

    return out_pad[:b] if b_pad != b else out_pad


# ---------------- logical-shape wrapper (== InputOptimizer.forward) ----------
def input_optimizer_forward(input_vectors, params, *, block_b=4096,
                            io_dtype=jnp.float32):
    """model(input_vectors) for the frozen, pre-padded model in `params`.

    This wrapper pays one pad + one slice to present logical shapes; an
    optimization loop should instead keep the padded layout end-to-end via
    `mlp_forward_padded`.
    """
    b, d_in = input_vectors.shape
    d_in_p = params["w1_pad"].shape[0]
    d_out = params["d_out"]

    sublane = 16 if jnp.dtype(io_dtype).itemsize == 2 else 8
    b_pad = _round_up(max(b, sublane), sublane)
    x_pad = (jnp.zeros((b_pad, d_in_p), io_dtype)
             .at[:b, :d_in].set(input_vectors.astype(io_dtype)))

    out_pad = mlp_forward_padded(
        x_pad, params["w1_pad"], params["b1_pad"], params["w2_pad"],
        params["b2_pad"], block_b=block_b, out_dtype=io_dtype)

    return out_pad[:b, :d_out].astype(input_vectors.dtype)


def _reference_forward(x, w1, b1, w2, b2):
    h = jnp.maximum(x @ w1 + b1, 0.0)
    return h @ w2 + b2


if __name__ == "__main__":
    key = jax.random.PRNGKey(0)
    k_x, k_w1, k_b1, k_w2, k_b2 = jax.random.split(key, 5)

    # Learnable input vectors (the nn.Parameter in InputOptimizer).
    input_vectors = jax.random.normal(k_x, (B, D_IN), dtype=jnp.float32)

    # Deterministic frozen model parameters.
    w1 = jax.random.normal(k_w1, (D_IN, HID), dtype=jnp.float32) * 0.1
    b1 = jax.random.normal(k_b1, (HID,), dtype=jnp.float32) * 0.01
    w2 = jax.random.normal(k_w2, (D_OUT and (HID, D_OUT))[0:2] if False else (HID, D_OUT), dtype=jnp.float32) * 0.1
    b2 = jax.random.normal(k_b2, (D_OUT,), dtype=jnp.float32) * 0.01

    # Pad the frozen model ONCE, outside the jitted forward (closed over, so
    # the logical dims stay static and the padded arrays become constants).
    params = prepare_frozen_model(w1, b1, w2, b2)
    forward = jax.jit(functools.partial(input_optimizer_forward, params=params))

    out = jax.block_until_ready(forward(input_vectors))

    ref = _reference_forward(input_vectors, w1, b1, w2, b2)
    assert out.shape == (B, D_OUT)
    assert jnp.allclose(out, ref, atol=1e-4, rtol=1e-4)

    print("KERNEL_OK")
</pallas_src>

<mosaic_0001>
module attributes {stable_mosaic.version = 11 : i64} {
  func.func @_mlp_forward_kernel(%arg0: i32, %arg1: memref<8x128xf32, #tpu.memory_space<vmem>>, %arg2: memref<128x128xf32, #tpu.memory_space<vmem>>, %arg3: memref<1x128xf32, #tpu.memory_space<vmem>>, %arg4: memref<128x128xf32, #tpu.memory_space<vmem>>, %arg5: memref<1x128xf32, #tpu.memory_space<vmem>>, %arg6: memref<8x128xf32, #tpu.memory_space<vmem>>) attributes {dimension_semantics = [#tpu.dimension_semantics<parallel>], iteration_bounds = array<i64: 1>, scalar_prefetch = 0 : i64, scratch_operands = 0 : i64, tpu.core_type = #tpu.core_type<tc>, window_params = [{transform_indices = @transform_0, window_bounds = array<i64: 8, 128>}, {pipeline_mode = #tpu.pipeline_mode<synchronous>, transform_indices = @transform_1, window_bounds = array<i64: 128, 128>}, {pipeline_mode = #tpu.pipeline_mode<synchronous>, transform_indices = @transform_2, window_bounds = array<i64: 1, 128>}, {pipeline_mode = #tpu.pipeline_mode<synchronous>, transform_indices = @transform_3, window_bounds = array<i64: 128, 128>}, {pipeline_mode = #tpu.pipeline_mode<synchronous>, transform_indices = @transform_4, window_bounds = array<i64: 1, 128>}, {transform_indices = @transform_5, window_bounds = array<i64: 8, 128>}]} {
    %c0 = arith.constant 0 : index
    %c0_0 = arith.constant 0 : index
    %0 = vector.load %arg1[%c0, %c0_0] : memref<8x128xf32, #tpu.memory_space<vmem>>, vector<8x128xf32>
    %c0_1 = arith.constant 0 : index
    %c0_2 = arith.constant 0 : index
    %1 = vector.load %arg2[%c0_1, %c0_2] : memref<128x128xf32, #tpu.memory_space<vmem>>, vector<128x128xf32>
    %cst = arith.constant dense<0.000000e+00> : vector<8x128xf32>
    %2 = tpu.matmul %0, %1, %cst {dimension_numbers = #tpu.dot_dimension_numbers<[1], [0], [0], [1], [0, 0, 1, 1], [], []>} : vector<8x128xf32>, vector<128x128xf32>, vector<8x128xf32> -> vector<8x128xf32>
    %c0_3 = arith.constant 0 : index
    %c0_4 = arith.constant 0 : index
    %3 = vector.load %arg3[%c0_3, %c0_4] : memref<1x128xf32, #tpu.memory_space<vmem>>, vector<1x128xf32>
    %4 = vector.broadcast %3 : vector<1x128xf32> to vector<8x128xf32>
    %5 = arith.addf %2, %4 : vector<8x128xf32>
    %cst_5 = arith.constant 0.000000e+00 : f32
    %6 = vector.broadcast %cst_5 : f32 to vector<8x128xf32>
    %7 = arith.maximumf %5, %6 : vector<8x128xf32>
    %c0_6 = arith.constant 0 : index
    %c0_7 = arith.constant 0 : index
    %8 = vector.load %arg4[%c0_6, %c0_7] : memref<128x128xf32, #tpu.memory_space<vmem>>, vector<128x128xf32>
    %cst_8 = arith.constant dense<0.000000e+00> : vector<8x128xf32>
    %9 = tpu.matmul %7, %8, %cst_8 {dimension_numbers = #tpu.dot_dimension_numbers<[1], [0], [0], [1], [0, 0, 1, 1], [], []>} : vector<8x128xf32>, vector<128x128xf32>, vector<8x128xf32> -> vector<8x128xf32>
    %c0_9 = arith.constant 0 : index
    %c0_10 = arith.constant 0 : index
    %10 = vector.load %arg5[%c0_9, %c0_10] : memref<1x128xf32, #tpu.memory_space<vmem>>, vector<1x128xf32>
    %11 = vector.broadcast %10 : vector<1x128xf32> to vector<8x128xf32>
    %12 = arith.addf %9, %11 : vector<8x128xf32>
    %c0_11 = arith.constant 0 : index
    %c0_12 = arith.constant 0 : index
    %13 = vector.load %arg6[%c0_11, %c0_12] : memref<8x128xf32, #tpu.memory_space<vmem>>, vector<8x128xf32>
    tpu.vector_store %arg6[%c0_11, %c0_12], %12 {strides = array<i32>} : memref<8x128xf32, #tpu.memory_space<vmem>>, vector<8x128xf32>,
    return
  }
  func.func @transform_0(%arg0: i32) -> (i32, i32) {
    %c0_i32 = arith.constant 0 : i32
    %c0_i32_0 = arith.constant 0 : i32
    return %arg0, %c0_i32 : i32, i32
  }
  func.func @transform_1(%arg0: i32) -> (i32, i32) {
    %c0_i32 = arith.constant 0 : i32
    %c0_i32_0 = arith.constant 0 : i32
    %c0_i32_1 = arith.constant 0 : i32
    return %c0_i32, %c0_i32_0 : i32, i32
  }
  func.func @transform_2(%arg0: i32) -> (i32, i32) {
    %c0_i32 = arith.constant 0 : i32
    %c0_i32_0 = arith.constant 0 : i32
    %c0_i32_1 = arith.constant 0 : i32
    return %c0_i32, %c0_i32_0 : i32, i32
  }
  func.func @transform_3(%arg0: i32) -> (i32, i32) {
    %c0_i32 = arith.constant 0 : i32
    %c0_i32_0 = arith.constant 0 : i32
    %c0_i32_1 = arith.constant 0 : i32
    return %c0_i32, %c0_i32_0 : i32, i32
  }
  func.func @transform_4(%arg0: i32) -> (i32, i32) {
    %c0_i32 = arith.constant 0 : i32
    %c0_i32_0 = arith.constant 0 : i32
    %c0_i32_1 = arith.constant 0 : i32
    return %c0_i32, %c0_i32_0 : i32, i32
  }
  func.func @transform_5(%arg0: i32) -> (i32, i32) {
    %c0_i32 = arith.constant 0 : i32
    %c0_i32_0 = arith.constant 0 : i32
    return %arg0, %c0_i32 : i32, i32
  }
}

</mosaic_0001>

<bundles_post_ra>
// kernel: input_optimizer_forward.1
= control target key start
LH: loop header
LB: loop body
LE: loop exit
PB: predicated region body
PF: predicated region fallthrough
CT: control target
= control target key end

     0   :  { %10 = vsyncpa [#allocation3], 0  ;;  %s587_s0 = inlined_call_operand.vmem [shape: f32[8,128], index: 0, kind: input, shape index: {}]   ;;  %s588_s1 = inlined_call_operand.hbm [shape: f32[128,128], index: 1, kind: input, shape index: {}]   ;;  %s589_s2 = inlined_call_operand.vmem [shape: f32[1,128], index: 2, kind: input, shape index: {}]   ;;  %s590_s3 = inlined_call_operand.hbm [shape: f32[128,128], index: 3, kind: input, shape index: {}]   ;;  %s591_s4 = inlined_call_operand.vmem [shape: f32[1,128], index: 4, kind: input, shape index: {}]   ;;  %s592_s5 = inlined_call_operand.hbm [shape: f32[8,128], index: 5, kind: output, shape index: {}]  }
   0x1   :  { %11 = vsyncpa [#allocation6], 0 }
   0x2   :  { %12 = vsyncpa [#allocation4], 0  ;;  %s488_s18 = smov [#allocation2]   ;;  %s416_s22 = scalar_lea.hbm %s588_s1, 2048 }
   0x3   :  { %s20_s19 = sshll.u32 %s488_s18, 4  ;;  %p417_p0 = scmp.ne.s32.totalorder %s588_s1, %s416_s22  ;;  %s21_s19 = int_to_ptr.vmem [resolvable:$true] %s20_s19 }
   0x4   :  { %p420_p1 = scmp.lt.u32.totalorder %s416_s22, %s588_s1 }
   0x6   :  { %p422_p2 = pnand %p420_p1, %p417_p0 }
   0x8   :  { %425 = shalt.err (!%p422_p2)
}
   0x9   :  { %s426_s27 = scalar_lea.vmem %s21_s19, 2048  ;;  %p431_p4 = scmp.lt.s32.totalorder %s21_s19, %s21_s19 }
   0xa   :  { %p427_p3 = scmp.ne.s32.totalorder %s21_s19, %s426_s27  ;;  %p432_p5 = scmp.lt.s32.totalorder %s426_s27, %s426_s27 }
   0xc   :  { %p433_p6 = por %p432_p5, %p431_p4 }
   0xe   :  { %p434_p7 = pnand %p433_p6, %p427_p3 }
  0x10   :  { %437 = shalt.err (!%p434_p7)
}
  0x11   :  { %s489_s28 = smov 128   ;;  %s490_s29 = smov 8  }
  0x12   :  { %26 = dma.hbm_to_vmem [thread:$0]  %s588_s1, 2048, %s21_s19, [#allocation3], %s489_s28, %s489_s28, %s490_s29  }
  0x13   :  { %s491_s7 = smov [#allocation5]   ;;  %s438_s11 = scalar_lea.hbm %s590_s3, 2048 }
  0x14   :  { %s34_s8 = sshll.u32 %s491_s7, 4  ;;  %p439_p8 = scmp.ne.s32.totalorder %s590_s3, %s438_s11  ;;  %s35_s8 = int_to_ptr.vmem [resolvable:$true] %s34_s8 }
  0x15   :  { %p442_p9 = scmp.lt.u32.totalorder %s438_s11, %s590_s3 }
  0x17   :  { %p444_p10 = pnand %p442_p9, %p439_p8 }
  0x19   :  { %447 = shalt.err (!%p444_p10)
}
  0x1a   :  { %s448_s16 = scalar_lea.vmem %s35_s8, 2048  ;;  %p453_p12 = scmp.lt.s32.totalorder %s35_s8, %s35_s8 }
  0x1b   :  { %p449_p11 = scmp.ne.s32.totalorder %s35_s8, %s448_s16  ;;  %p454_p13 = scmp.lt.s32.totalorder %s448_s16, %s448_s16 }
  0x1d   :  { %p455_p0 = por %p454_p13, %p453_p12 }
  0x1f   :  { %p456_p1 = pnand %p455_p0, %p449_p11 }
  0x21   :  { %459 = shalt.err (!%p456_p1)
}
  0x22   :  { %40 = dma.hbm_to_vmem [thread:$0]  %s590_s3, 2048, %s35_s8, [#allocation6], %s489_s28, %s489_s28, %s490_s29  }
  0x23   :  { %482 = dma.done.wait [#allocation3], 2048  }
  0x24   :  { %483 = vsyncadd [#allocation3], 4294965248 }
  0x25   :  { %484 = dma.done.wait [#allocation6], 2048  }
  0x26   :  { %485 = vsyncadd [#allocation6], 4294965248  ;;  %v492_v0 = vmov 0.0|0.0   ;;  %vm493_vm0 = vmmov 0   ;;  %v494_v1 = vmov 0.0   ;;  %v50_v2 = vld [vmem:[#allocation2] sm:$0xff] }
  0x27   :  { %360 = vmatprep.subr.bf16.mxu0 %v492_v0  ;;  %322 = vmatprep.mubr.msk.f32.mxu0 %vm493_vm0, %v494_v1  ;;  %v51_v3 = vld [vmem:[#allocation2 + $0x8] sm:$0xff]  ;;  %v52_v4 = vld [vmem:[#allocation2 + $0x10] sm:$0xff]  ;;  %v53_v6 = vld [vmem:[#allocation2 + $0x18] sm:$0xff] }
  0x28   :  { %384 = vmatprep.subr.bf16.mxu1 %v492_v0  ;;  %357 = vmatprep.mubr.msk.f32.mxu1 %vm493_vm0, %v494_v1  ;;  %v361_v5 = vpack.c.bf16 %v51_v3, %v50_v2  ;;  %v364_v7 = vpack.c.bf16 %v53_v6, %v52_v4  ;;  %v54_v8 = vld [vmem:[#allocation2 + $0x20] sm:$0xff]  ;;  %v55_v9 = vld [vmem:[#allocation2 + $0x28] sm:$0xff]  ;;  %v146_v12 = vld [vmem:[#allocation5 + $0x10] sm:$0xff] }
  0x29   :  { %v144_v10 = vld [vmem:[#allocation5] sm:$0xff]  ;;  %v145_v11 = vld [vmem:[#allocation5 + $0x8] sm:$0xff]  ;;  %v147_v13 = vld [vmem:[#allocation5 + $0x18] sm:$0xff]  ;;  %v367_v14 = vpack.c.bf16 %v55_v9, %v54_v8 }
  0x2a   :  { %362 = vmatpush3.bf16.msra.mxu0 %v361_v5  ;;  %v385_v15 = vpack.c.bf16 %v145_v11, %v144_v10  ;;  %v56_v16 = vld [vmem:[#allocation2 + $0x30] sm:$0xff]  ;;  %v57_v17 = vld [vmem:[#allocation2 + $0x38] sm:$0xff]  ;;  %v388_v18 = vpack.c.bf16 %v147_v13, %v146_v12  ;;  %v148_v19 = vld [vmem:[#allocation5 + $0x20] sm:$0xff] }
  0x2b   :  { %363 = vmatprep.subr.bf16.mxu0 %v492_v0  ;;  %v149_v20 = vld [vmem:[#allocation5 + $0x28] sm:$0xff]  ;;  %v370_v21 = vpack.c.bf16 %v57_v17, %v56_v16  ;;  %v58_v22 = vld [vmem:[#allocation2 + $0x40] sm:$0xff]  ;;  %v150_v25 = vld [vmem:[#allocation5 + $0x30] sm:$0xff] }
  0x2c   :  { %386 = vmatpush3.bf16.msra.mxu1 %v385_v15  ;;  %v59_v23 = vld [vmem:[#allocation2 + $0x48] sm:$0xff]  ;;  %v391_v24 = vpack.c.bf16 %v149_v20, %v148_v19  ;;  %v151_v26 = vld [vmem:[#allocation5 + $0x38] sm:$0xff]  ;;  %v60_v28 = vld [vmem:[#allocation2 + $0x50] sm:$0xff] }
  0x2d   :  { %387 = vmatprep.subr.bf16.mxu1 %v492_v0  ;;  %v373_v27 = vpack.c.bf16 %v59_v23, %v58_v22  ;;  %v61_v29 = vld [vmem:[#allocation2 + $0x58] sm:$0xff]  ;;  %v394_v30 = vpack.c.bf16 %v151_v26, %v150_v25  ;;  %v152_v31 = vld [vmem:[#allocation5 + $0x40] sm:$0xff]  ;;  %v153_v32 = vld [vmem:[#allocation5 + $0x48] sm:$0xff] }
  0x2e   :  { %365 = vmatpush3.bf16.msra.mxu0 %v364_v7  ;;  %v376_v33 = vpack.c.bf16 %v61_v29, %v60_v28  ;;  %v62_v34 = vld [vmem:[#allocation2 + $0x60] sm:$0xff]  ;;  %v63_v35 = vld [vmem:[#allocation2 + $0x68] sm:$0xff]  ;;  %v397_v36 = vpack.c.bf16 %v153_v32, %v152_v31  ;;  %v154_v37 = vld [vmem:[#allocation5 + $0x50] sm:$0xff] }
  0x2f   :  { %366 = vmatprep.subr.bf16.mxu0 %v492_v0  ;;  %v155_v38 = vld [vmem:[#allocation5 + $0x58] sm:$0xff]  ;;  %v379_v39 = vpack.c.bf16 %v63_v35, %v62_v34  ;;  %v64_v40 = vld [vmem:[#allocation2 + $0x70] sm:$0xff]  ;;  %v156_v43 = vld [vmem:[#allocation5 + $0x60] sm:$0xff] }
  0x30   :  { %389 = vmatpush3.bf16.msra.mxu1 %v388_v18  ;;  %v65_v41 = vld [vmem:[#allocation2 + $0x78] sm:$0xff]  ;;  %v400_v42 = vpack.c.bf16 %v155_v38, %v154_v37  ;;  %v157_v44 = vld [vmem:[#allocation5 + $0x68] sm:$0xff]  ;;  %v49_v47 = vld [vmem:[%s587_s0] sm:$0xff]  ;;  %s495_s0 = smov [#allocation7]  }
  0x31   :  { %390 = vmatprep.subr.bf16.mxu1 %v492_v0  ;;  %v382_v45 = vpack.c.bf16 %v65_v41, %v64_v40  ;;  %v403_v46 = vpack.c.bf16 %v157_v44, %v156_v43  ;;  %v158_v48 = vld [vmem:[#allocation5 + $0x70] sm:$0xff]  ;;  %v159_v49 = vld [vmem:[#allocation5 + $0x78] sm:$0xff]  ;;  %v254_v51 = vld [vmem:[%s589_s2] ss:$0 sm:$0xff]  ;;  %s244_s23 = sshll.u32 %s495_s0, 4  ;;  %s245_s23 = int_to_ptr.vmem [resolvable:$true] %s244_s23 }
  0x32   :  { %368 = vmatpush3.bf16.msra.mxu0 %v367_v14  ;;  %v406_v50 = vpack.c.bf16 %v159_v49, %v158_v48  ;;  %v255_v56 = vld [vmem:[%s591_s4] ss:$0 sm:$0xff]  ;;  %s460_s24 = scalar_lea.vmem %s245_s23, 128  ;;  %p465_p3 = scmp.lt.s32.totalorder %s245_s23, %s245_s23 }
  0x33   :  { %369 = vmatprep.subr.bf16.mxu0 %v492_v0  ;;  %p461_p2 = scmp.ne.s32.totalorder %s245_s23, %s460_s24  ;;  %p466_p4 = scmp.lt.s32.totalorder %s460_s24, %s460_s24 }
  0x34   :  { %392 = vmatpush3.bf16.msra.mxu1 %v391_v24 }
  0x35   :  { %393 = vmatprep.subr.bf16.mxu1 %v492_v0  ;;  %p467_p5 = por %p466_p4, %p465_p3 }
  0x36   :  { %371 = vmatpush3.bf16.msra.mxu0 %v370_v21 }
  0x37   :  { %372 = vmatprep.subr.bf16.mxu0 %v492_v0  ;;  %p468_p6 = pnand %p467_p5, %p461_p2 }
  0x38   :  { %395 = vmatpush3.bf16.msra.mxu1 %v394_v30 }
  0x39   :  { %396 = vmatprep.subr.bf16.mxu1 %v492_v0 }
  0x3a   :  { %374 = vmatpush3.bf16.msra.mxu0 %v373_v27 }
  0x3b   :  { %375 = vmatprep.subr.bf16.mxu0 %v492_v0 }
  0x3c   :  { %398 = vmatpush3.bf16.msra.mxu1 %v397_v36 }
  0x3d   :  { %399 = vmatprep.subr.bf16.mxu1 %v492_v0 }
  0x3e   :  { %377 = vmatpush3.bf16.msra.mxu0 %v376_v33 }
  0x3f   :  { %378 = vmatprep.subr.bf16.mxu0 %v492_v0 }
  0x40   :  { %401 = vmatpush3.bf16.msra.mxu1 %v400_v42 }
  0x41   :  { %402 = vmatprep.subr.bf16.mxu1 %v492_v0 }
  0x42   :  { %380 = vmatpush3.bf16.msra.mxu0 %v379_v39 }
  0x43   :  { %381 = vmatprep.subr.bf16.mxu0 %v492_v0 }
  0x44   :  { %404 = vmatpush3.bf16.msra.mxu1 %v403_v46 }
  0x45   :  { %405 = vmatprep.subr.bf16.mxu1 %v492_v0 }
  0x46   :  { %383 = vmatpush3.bf16.msra.mxu0 %v382_v45 }
  0x48   :  { %407 = vmatpush3.bf16.msra.mxu1 %v406_v50 }
  0x49   :  { %323 = vmatmul.mubr.f32.vlgmr.msra.gmra.mrb[0].mxu0 %v49_v47 }
 0x11c   :  { %v139_v52 = vpop.f32.mrb[0].mxu0 }
 0x11d   :  { %v140_v53 = vadd.f32 %v254_v51, %v139_v52  ;;  %v324_v54 = vpop.f32.mrb[1].mxu0 }
 0x11f   :  { %v143_v55 = vmax.f32 %v140_v53, 0.0 }
 0x121   :  { %358 = vmatmul.mubr.f32.vlgmr.msra.gmra.mrb[0].mxu1 %v143_v55 }
 0x1f4   :  { %v233_v57 = vpop.f32.mrb[0].mxu1 }
 0x1f5   :  { %v234_v58 = vadd.f32 %v255_v56, %v233_v57  ;;  %v359_v59 = vpop.f32.mrb[1].mxu1 }
 0x1f7   :  { %237 = vst [vmem:[#allocation7] sm:$0xff] %v234_v58 }
 0x1f8   :  { %471 = shalt.err (!%p468_p6)
}
 0x1f9   :  { %s472_s26 = scalar_lea.hbm %s592_s5, 128 }
 0x1fa   :  { %p473_p7 = scmp.ne.s32.totalorder %s592_s5, %s472_s26  ;;  %p476_p8 = scmp.lt.u32.totalorder %s472_s26, %s592_s5 }
 0x1fc   :  { %p478_p9 = pnand %p476_p8, %p473_p7 }
 0x1fe   :  { %481 = shalt.err (!%p478_p9)
}
 0x1ff   :  { %247 = dma.vmem_to_hbm [thread:$0]  %s245_s23, 128, %s592_s5, [#allocation4]  }
 0x200   :  { %486 = dma.done.wait [#allocation4], 128  }
 0x201   :  { %487 = vsyncadd [#allocation4], 4294967168 }
 0x202   :  { %251 = vsyncpa [#allocation3], 1 }
 0x203   :  { %252 = vsyncpa [#allocation6], 1 }
 0x204   :  { %253 = vsyncpa [#allocation4], 1 }

</bundles_post_ra>
